<compile_context>
chip_gen: v7x
topology: tpu7x:2x2x1
jax: 0.10.0
libtpu: 0.0.40
codegen_flags: <defaults>
</compile_context>

<pallas_src>
import math

import jax
import jax.numpy as jnp
import numpy as np
from jax.experimental import pallas as pl
from jax.experimental.pallas import tpu as pltpu


# Coefficients of the degree-15 odd Taylor polynomial for  f(r) = -sin(2*pi*r),
# accurate to ~1e-6 absolute on r in [-0.5, 0.5].
_NEG_SIN2PI_COEFFS = tuple(
    (-1.0) ** (k + 1) * (2.0 * math.pi) ** (2 * k + 1) / math.factorial(2 * k + 1)
    for k in range(8)
)


def _pe_kernel(pd_ref, w_ref, coef_ref, out_ref):
    """One row-tile of the positional-embedding computation.

    pd_ref:   (1, K, T)  f32  base-128 digits of the clamped positions, lane-dense;
                              row k = g*ndig + d holds digit d of packed group g.
    w_ref:    (K, GD)    f32  digit-recombination / group-scatter matrix (resident).
    coef_ref: (2, GD)    f32  row 0: inv_freq / (2*pi)   (turns per position)
                              row 1: phase in turns (0.0 even lane, 0.25 odd lane).
    out_ref:  (1, T, GD) out dtype
    """
    pd = pd_ref[0]                                        # (K, T)

    # MXU: recombine digits and scatter each packed position across its dim-wide
    # lane slot:  pos[t, l] = position of group l // dim at row t.
    # Exact for any matmul precision: all operands are small integers.
    pos = jax.lax.dot_general(
        pd, w_ref[...],
        dimension_numbers=(((0,), (0,)), ((), ())),       # contract over K
        preferred_element_type=jnp.float32)               # (T, GD)

    c = coef_ref[0:1, :]                                  # (1, GD) turns / position
    phase = coef_ref[1:2, :]                              # (1, GD) 0.0 or 0.25 turns

    # Turn-based range reduction: one f32 multiply (bit-matching the reference-style
    # p * const product), reduce mod 1, add the exact cos phase, reduce again so the
    # pi/2 phase never rides on a large argument.
    t = pos * c
    t = t - jnp.floor(t)                                  # [0, 1)
    t = t + phase                                         # [0, 1.25)
    t = t - jnp.floor(t)                                  # [0, 1)
    r = t - 0.5                                           # [-0.5, 0.5); sin(2*pi*t) = -sin(2*pi*r)

    r2 = r * r
    s = r2 * _NEG_SIN2PI_COEFFS[7] + _NEG_SIN2PI_COEFFS[6]
    for ck in _NEG_SIN2PI_COEFFS[5::-1]:
        s = s * r2 + ck
    out_ref[0] = (s * r).astype(out_ref.dtype)


def _multi_core_chip() -> bool:
    """True on chips with >1 TensorCore (v7x-class), where >=2 grid blocks matter."""
    try:
        dev = jax.devices()[0]
        if int(getattr(dev, "num_cores", 1)) > 1:
            return True
        kind = str(getattr(dev, "device_kind", "")).lower()
        return "v7" in kind or "7x" in kind
    except Exception:  # pragma: no cover - conservative fallback
        return False


def sinusoidal_positional_embedding(positions: jax.Array,
                                    dim: int,
                                    max_position_embeddings: int = 2048,
                                    out_dtype=jnp.float32) -> jax.Array:
    """positions: [B, S] integer array -> [B, S, dim] embeddings (matches the torch module)."""
    if dim % 2 != 0:
        raise ValueError("dim must be even (the torch module requires it).")
    B, S = positions.shape
    max_pos = int(max_position_embeddings)
    itemsize = jnp.dtype(out_dtype).itemsize

    # --- packing: `groups` consecutive positions per output row so the stored lane
    # width (groups*dim) is a multiple of 128 -> unmasked, lane-dense stores.
    if dim % 128 == 0:
        groups = 1
    else:
        g = 128 // math.gcd(dim, 128)
        # TODO(synk): dims that are not a multiple of 8 would need >16 packed positions
        # per row; fall back to (slower) masked partial stores for those rare dims.
        groups = g if g <= 16 else 1
    gd = groups * dim

    # --- row tiling: ~4 MiB output blocks, even division of the (padded) row count,
    # and at least two grid blocks on multi-core chips.
    sg0 = -(-S // groups)                         # packed rows needed to cover S
    row_bytes = gd * itemsize
    target_rows = max(1, (4 << 20) // row_bytes)
    n_blocks = max(1, -(-sg0 // target_rows))
    if _multi_core_chip() and B * n_blocks < 2 and sg0 >= 256:
        n_blocks = max(n_blocks, 2)
    if n_blocks == 1:
        tile = sg = sg0                           # single full block along rows
    else:
        per = -(-sg0 // n_blocks)
        tile = -(-per // 128) * 128               # 128-aligned -> lane/sublane dense blocks
        sg = tile * n_blocks
    S_pad = sg * groups

    # --- positions: clamp like torch, wrap negatives like pe[-k], split into base-128
    # digits (exact under any matmul precision) and lay out lane-dense as (B, K, sg).
    ndig = max(1, math.ceil(math.log2(max(2, max_pos)) / 7.0))   # 128**ndig >= max_pos
    p = jnp.asarray(positions).astype(jnp.int32)
    p = jnp.minimum(p, max_pos - 1)               # torch .clamp(max=max_pos - 1)
    p = jnp.where(p < 0, p + max_pos, p)          # torch negative indexing wraps
    p = jnp.clip(p, 0, max_pos - 1)               # guard out-of-range / padded rows
    if S_pad != S:
        p = jnp.pad(p, ((0, 0), (0, S_pad - S)))
    p3 = p.reshape(B, sg, groups)
    digs = [(p3 // (128 ** d)) % 128 for d in range(ndig)]
    pd = jnp.stack(digs, axis=-1).reshape(B, sg, groups * ndig)  # k = g*ndig + d
    pd = pd.transpose(0, 2, 1).astype(jnp.float32)               # (B, K0, sg), lane-dense
    K0 = groups * ndig
    K = max(8, -(-K0 // 8) * 8)
    if K != K0:
        pd = jnp.pad(pd, ((0, 0), (0, K - K0), (0, 0)))

    # --- per-lane constants (built once; resident VMEM inputs).
    inv_freq = jnp.exp(jnp.arange(0, dim, 2, dtype=jnp.float32) *
                       jnp.float32(-math.log(10000.0) / dim))    # (dim//2,)
    c_lane = jnp.tile(jnp.repeat(inv_freq, 2), groups) * jnp.float32(1.0 / (2.0 * math.pi))
    phase_lane = jnp.tile(jnp.tile(jnp.array([0.0, 0.25], jnp.float32), dim // 2), groups)
    coef = jnp.stack([c_lane, phase_lane])                       # (2, gd)

    w_np = np.zeros((K, gd), np.float32)                         # digit recombine + scatter
    lane_group = np.arange(gd) // dim
    for g_i in range(groups):
        for d_i in range(ndig):
            w_np[g_i * ndig + d_i, lane_group == g_i] = float(128 ** d_i)
    w = jnp.asarray(w_np)                                        # (K, gd)

    out = pl.pallas_call(
        _pe_kernel,
        out_shape=jax.ShapeDtypeStruct((B, sg, gd), out_dtype),
        grid=(B, sg // tile),
        in_specs=[
            pl.BlockSpec((1, K, tile), lambda b, s: (b, 0, s)),  # position digits
            pl.BlockSpec((K, gd), lambda b, s: (0, 0)),          # resident W
            pl.BlockSpec((2, gd), lambda b, s: (0, 0)),          # resident inv_freq / phase
        ],
        out_specs=pl.BlockSpec((1, tile, gd), lambda b, s: (b, s, 0)),
        compiler_params=pltpu.CompilerParams(
            dimension_semantics=("parallel", "parallel"),
            vmem_limit_bytes=32 * 1024 * 1024),
    )(pd, w, coef)

    # Row-major contiguous reshape: (B, sg, groups*dim) -> (B, S_pad, dim) is a no-op;
    # drop the (few) padded rows if S was not a multiple of the packing factor.
    out = out.reshape(B, S_pad, dim)
    if S_pad != S:
        out = out[:, :S, :]
    return out


def _reference(positions, dim, max_pos):
    # Pure-JAX port of the PyTorch module (build table, clamp, gather; negatives wrap).
    position = jnp.arange(max_pos, dtype=jnp.float32)[:, None]
    div_term = jnp.exp(
        jnp.arange(0, dim, 2, dtype=jnp.float32) * (-math.log(10000.0) / dim))
    pe = jnp.zeros((max_pos, dim), jnp.float32)
    pe = pe.at[:, 0::2].set(jnp.sin(position * div_term))
    pe = pe.at[:, 1::2].set(jnp.cos(position * div_term))
    idx = jnp.minimum(positions, max_pos - 1)
    idx = jnp.where(idx < 0, idx + max_pos, idx)
    return pe[idx]


if __name__ == "__main__":
    key = jax.random.PRNGKey(0)
    k1, k2, k3 = jax.random.split(key, 3)

    # Case 1: dim < 128 -> grouped lane-dense path (dim=32 -> 4 positions per 128-lane
    # row); includes values above max_pos (clamp) and below 0 (torch-style wrap).
    B, S, DIM, MAX_POS = 2, 8, 32, 128
    pos1 = jax.random.randint(k1, (B, S), minval=-2, maxval=200, dtype=jnp.int32)
    out1 = jax.block_until_ready(sinusoidal_positional_embedding(pos1, DIM, MAX_POS))
    ref1 = _reference(pos1, DIM, MAX_POS)
    assert out1.shape == (B, S, DIM) and out1.dtype == jnp.float32
    assert jnp.allclose(out1, ref1, rtol=1e-5, atol=1e-4), "mismatch vs. reference (case 1)"

    # Case 2: dim a multiple of 128 -> ungrouped path (already lane-dense).
    B2, S2, DIM2, MAX_POS2 = 1, 16, 256, 2048
    pos2 = jax.random.randint(k2, (B2, S2), minval=0, maxval=300, dtype=jnp.int32)
    out2 = jax.block_until_ready(sinusoidal_positional_embedding(pos2, DIM2, MAX_POS2))
    ref2 = _reference(pos2, DIM2, MAX_POS2)
    assert out2.shape == (B2, S2, DIM2) and out2.dtype == jnp.float32
    assert jnp.allclose(out2, ref2, rtol=1e-5, atol=1e-4), "mismatch vs. reference (case 2)"

    # Case 3: S not a multiple of the packing factor (padded, then sliced) + bf16 output.
    B3, S3, DIM3, MAX_POS3 = 2, 10, 32, 512
    pos3 = jax.random.randint(k3, (B3, S3), minval=0, maxval=512, dtype=jnp.int32)
    out3 = jax.block_until_ready(
        sinusoidal_positional_embedding(pos3, DIM3, MAX_POS3, out_dtype=jnp.bfloat16))
    ref3 = _reference(pos3, DIM3, MAX_POS3)
    assert out3.shape == (B3, S3, DIM3) and out3.dtype == jnp.bfloat16
    assert jnp.allclose(out3.astype(jnp.float32), ref3, rtol=0.0, atol=1e-2), \
        "mismatch vs. reference (case 3)"

    print("KERNEL_OK")
</pallas_src>

<mosaic_0001>
module attributes {stable_mosaic.version = 11 : i64} {
  func.func @_pe_kernel(%arg0: i32, %arg1: i32, %arg2: memref<1x8x2xf32, #tpu.memory_space<vmem>>, %arg3: memref<8x128xf32, #tpu.memory_space<vmem>>, %arg4: memref<2x128xf32, #tpu.memory_space<vmem>>, %arg5: memref<1x2x128xf32, #tpu.memory_space<vmem>>) attributes {dimension_semantics = [#tpu.dimension_semantics<parallel>, #tpu.dimension_semantics<parallel>], iteration_bounds = array<i64: 2, 1>, scalar_prefetch = 0 : i64, scratch_operands = 0 : i64, tpu.core_type = #tpu.core_type<tc>, window_params = [{transform_indices = @transform_0, window_bounds = array<i64: 1, 8, 2>}, {pipeline_mode = #tpu.pipeline_mode<synchronous>, transform_indices = @transform_1, window_bounds = array<i64: 8, 128>}, {pipeline_mode = #tpu.pipeline_mode<synchronous>, transform_indices = @transform_2, window_bounds = array<i64: 2, 128>}, {transform_indices = @transform_3, window_bounds = array<i64: 1, 2, 128>}]} {
    %c0 = arith.constant 0 : index
    %c0_0 = arith.constant 0 : index
    %c0_1 = arith.constant 0 : index
    %0 = vector.load %arg2[%c0, %c0_0, %c0_1] : memref<1x8x2xf32, #tpu.memory_space<vmem>>, vector<1x8x2xf32>
    %1 = vector.shape_cast %0 : vector<1x8x2xf32> to vector<8x2xf32>
    %c0_2 = arith.constant 0 : index
    %c0_3 = arith.constant 0 : index
    %2 = vector.load %arg3[%c0_2, %c0_3] : memref<8x128xf32, #tpu.memory_space<vmem>>, vector<8x128xf32>
    %cst = arith.constant dense<0.000000e+00> : vector<2x128xf32>
    %3 = tpu.matmul %1, %2, %cst {dimension_numbers = #tpu.dot_dimension_numbers<[0], [0], [1], [1], [0, 1, 1, 1], [], []>} : vector<8x2xf32>, vector<8x128xf32>, vector<2x128xf32> -> vector<2x128xf32>
    %c0_4 = arith.constant 0 : index
    %c0_5 = arith.constant 0 : index
    %4 = vector.load %arg4[%c0_4, %c0_5] : memref<2x128xf32, #tpu.memory_space<vmem>>, vector<1x128xf32>
    %c1 = arith.constant 1 : index
    %c0_6 = arith.constant 0 : index
    %5 = vector.load %arg4[%c1, %c0_6] : memref<2x128xf32, #tpu.memory_space<vmem>>, vector<1x128xf32>
    %6 = vector.broadcast %4 : vector<1x128xf32> to vector<2x128xf32>
    %7 = arith.mulf %3, %6 : vector<2x128xf32>
    %8 = math.floor %7 : vector<2x128xf32>
    %9 = arith.subf %7, %8 : vector<2x128xf32>
    %10 = vector.broadcast %5 : vector<1x128xf32> to vector<2x128xf32>
    %11 = arith.addf %9, %10 : vector<2x128xf32>
    %12 = math.floor %11 : vector<2x128xf32>
    %13 = arith.subf %11, %12 : vector<2x128xf32>
    %cst_7 = arith.constant 5.000000e-01 : f32
    %14 = vector.broadcast %cst_7 : f32 to vector<2x128xf32>
    %15 = arith.subf %13, %14 : vector<2x128xf32>
    %16 = arith.mulf %15, %15 : vector<2x128xf32>
    %cst_8 = arith.constant 0.718122303 : f32
    %17 = vector.broadcast %cst_8 : f32 to vector<2x128xf32>
    %18 = arith.mulf %16, %17 : vector<2x128xf32>
    %cst_9 = arith.constant -3.81995249 : f32
    %19 = vector.broadcast %cst_9 : f32 to vector<2x128xf32>
    %20 = arith.addf %18, %19 : vector<2x128xf32>
    %21 = arith.mulf %20, %16 : vector<2x128xf32>
    %cst_10 = arith.constant 15.0946426 : f32
    %22 = vector.broadcast %cst_10 : f32 to vector<2x128xf32>
    %23 = arith.addf %21, %22 : vector<2x128xf32>
    %24 = arith.mulf %23, %16 : vector<2x128xf32>
    %cst_11 = arith.constant -42.0586929 : f32
    %25 = vector.broadcast %cst_11 : f32 to vector<2x128xf32>
    %26 = arith.addf %24, %25 : vector<2x128xf32>
    %27 = arith.mulf %26, %16 : vector<2x128xf32>
    %cst_12 = arith.constant 76.7058563 : f32
    %28 = vector.broadcast %cst_12 : f32 to vector<2x128xf32>
    %29 = arith.addf %27, %28 : vector<2x128xf32>
    %30 = arith.mulf %29, %16 : vector<2x128xf32>
    %cst_13 = arith.constant -81.6052475 : f32
    %31 = vector.broadcast %cst_13 : f32 to vector<2x128xf32>
    %32 = arith.addf %30, %31 : vector<2x128xf32>
    %33 = arith.mulf %32, %16 : vector<2x128xf32>
    %cst_14 = arith.constant 4.134170e+01 : f32
    %34 = vector.broadcast %cst_14 : f32 to vector<2x128xf32>
    %35 = arith.addf %33, %34 : vector<2x128xf32>
    %36 = arith.mulf %35, %16 : vector<2x128xf32>
    %cst_15 = arith.constant -6.28318548 : f32
    %37 = vector.broadcast %cst_15 : f32 to vector<2x128xf32>
    %38 = arith.addf %36, %37 : vector<2x128xf32>
    %39 = arith.mulf %38, %15 : vector<2x128xf32>
    %c0_16 = arith.constant 0 : index
    %c0_17 = arith.constant 0 : index
    %c0_18 = arith.constant 0 : index
    %40 = vector.load %arg5[%c0_16, %c0_17, %c0_18] : memref<1x2x128xf32, #tpu.memory_space<vmem>>, vector<1x2x128xf32>
    %41 = vector.shape_cast %40 : vector<1x2x128xf32> to vector<2x128xf32>
    %42 = vector.shape_cast %39 : vector<2x128xf32> to vector<1x2x128xf32>
    tpu.vector_store %arg5[%c0_16, %c0_17, %c0_18], %42 {strides = array<i32>} : memref<1x2x128xf32, #tpu.memory_space<vmem>>, vector<1x2x128xf32>,
    return
  }
  func.func @transform_0(%arg0: i32, %arg1: i32) -> (i32, i32, i32) {
    %c0_i32 = arith.constant 0 : i32
    %c0_i32_0 = arith.constant 0 : i32
    return %arg0, %c0_i32, %arg1 : i32, i32, i32
  }
  func.func @transform_1(%arg0: i32, %arg1: i32) -> (i32, i32) {
    %c0_i32 = arith.constant 0 : i32
    %c0_i32_0 = arith.constant 0 : i32
    %c0_i32_1 = arith.constant 0 : i32
    return %c0_i32, %c0_i32_0 : i32, i32
  }
  func.func @transform_2(%arg0: i32, %arg1: i32) -> (i32, i32) {
    %c0_i32 = arith.constant 0 : i32
    %c0_i32_0 = arith.constant 0 : i32
    %c0_i32_1 = arith.constant 0 : i32
    return %c0_i32, %c0_i32_0 : i32, i32
  }
  func.func @transform_3(%arg0: i32, %arg1: i32) -> (i32, i32, i32) {
    %c0_i32 = arith.constant 0 : i32
    %c0_i32_0 = arith.constant 0 : i32
    return %arg0, %arg1, %c0_i32 : i32, i32, i32
  }
}

</mosaic_0001>

<bundles_post_ra>
// kernel: tpu_custom_call.1
= control target key start
LH: loop header
LB: loop body
LE: loop exit
PB: predicated region body
PF: predicated region fallthrough
CT: control target
= control target key end

     0   :  { %8 = vsyncpa [#allocation3], 0  ;;  %s722_s0 = inlined_call_operand.vmem [shape: f32[2,8,2], index: 0, kind: input, shape index: {}]   ;;  %s723_s1 = inlined_call_operand.vmem [shape: f32[8,128], index: 1, kind: input, shape index: {}]   ;;  %s724_s2 = inlined_call_operand.vmem [shape: f32[2,128], index: 2, kind: input, shape index: {}]   ;;  %s725_s3 = inlined_call_operand.hbm [shape: f32[2,2,128], index: 3, kind: output, shape index: {}]  }
   0x1   :  { %10 = vsyncpa [#allocation3 + $0x1], 0  ;;  %s601_s12 = smov 0   ;;  %s603_s13 = smov 0  }
   0x2   :  { %s605_s14 = smov 0   ;;  %s607_s15 = smov 0  }
   0x3   :  { %s609_s16 = smov 0   ;;  %s611_s17 = smov 0  }
   0x4 LB: > { %s419_s18 = sadd.s32 4294967295, %s576_s17   ;;  %s420_s19 = sadd.s32 4294967294, %s576_s17   ;;  %s576_s17 = sphi %s611_s17, %s16_s17   ;;  %s572_s16 = sphi %s609_s16, %s732_s16   ;;  %s568_s15 = sphi %s607_s15, %s731_s15   ;;  %s564_s14 = sphi %s605_s14, %s730_s14   ;;  %s560_s13 = sphi %s603_s13, %s729_s13   ;;  %s556_s12 = sphi %s601_s12, %s728_s12  }
   0x5   : > { %s28_s20 = sadd.s32 1, %s572_s16  ;;  %s107_s21 = sadd.s32 1, %s564_s14 }
   0x6   : > { %p30_p0 = scmp.ge.s32.totalorder %s28_s20, 2  ;;  %p117_p1 = scmp.ne.s32.totalorder %s564_s14, %s560_s13 }
   0x7   : > { %p118_p2 = scmp.eq.s32.totalorder %s419_s18, 1  ;;  %p123_p3 = scmp.ne.s32.totalorder %s560_s13, %s556_s12 }
   0x8   : > { %s734_s20 = smov (%p30_p0, %s28_s20), 0  ;;  %p124_p5 = scmp.eq.s32.totalorder %s420_s19, 1 }
   0x9   : > { %p641_p4 = por %p118_p2, %p117_p1  ;;  %s102_s23 = ssub.s32 %s572_s16, %s734_s20 }
   0xa   : > { %p423_p6 = scmp.ge.s32.totalorder %s576_s17, 1  ;;  %p105_p7 = scmp.eq.s32.totalorder %s102_s23, 0 }
   0xb   : > { %p648_p8 = por %p124_p5, %p123_p3  ;;  %p158_p9 = scmp.lt.s32.totalorder %s576_s17, 3 }
   0xc   : > { %s654_s25 = scalar_select %p105_p7, %s564_s14, %s107_s21  }
   0xd   : > { %p159_p10 = pnand %p423_p6, %p158_p9 }
   0xe   : > { %p184_p11 = scmp.lt.s32.totalorder (!%p159_p10), %s568_s15, 1  ;;  %v192_v0 = vld [vmem:[%s723_s1] sm:$0xff] (!%p159_p10)  ;;  %v578_v1 = vmov (!%p159_p10), 0.0   ;;  %vm579_vm0 = vmmov (!%p159_p10), 0   ;;  %vm225_vm1 = vcmask (!%p159_p10), 64512   ;;  %s181_s10 = sand.u32 (!%p159_p10), 1, %s560_s13  }
   0xf   : > { %162 = sbr.rel (%p159_p10) target bundleno = 428 (0x1ac), region = 32  ;;  %436 = vmatprep.subr.mxu0 (!%p159_p10), %v578_v1  ;;  %438 = vmatprep.mubr.msk.f32.mxu0 (!%p159_p10), %vm579_vm0, %v578_v1  ;;  %v427_v4 = vld [vmem:[%s724_s2] ss:$0 sm:$0xff] (!%p159_p10)  ;;  %v428_v9 = vld [vmem:[%s724_s2 + $0x1] ss:$0 sm:$0xff] (!%p159_p10)  ;;  %s424_s11 = sshll.u32 (!%p159_p10), %s181_s10, 1 }
  0x10   : > { %437 = vmatpush3.msra.mxu0 (!%p159_p10), %v192_v0  ;;  %s431_s18 = sshll.u32 (!%p159_p10), %s568_s15, 5  ;;  %s183_s19 = scalar_lea.vmem (!%p159_p10), [#allocation2], %s424_s11 }
  0x11   : > { %s348_s21 = sshll.u32 (!%p159_p10), %s183_s19, 4  ;;  %s675_s27 = scalar_lea.hbm (!%p159_p10), %s725_s3, %s431_s18  ;;  %s677_s21 = int_to_ptr.vmem [resolvable:$true] %s348_s21 }
  0x16   : > { %s185_s28 = scalar_select %p184_p11, %s568_s15, 1 }
  0x17   : > { %s580_s15 = smov [#allocation2]  }
  0x18   : > { %s425_s29 = sshll.u32 %s185_s28, 3  ;;  %s334_s28 = scalar_lea.sflag [#allocation3], %s181_s10 }
  0x19   : > { %s190_s5 = scalar_lea.vmem %s722_s0, %s425_s29  ;;  %s498_s29 = scalar_lea.vmem %s677_s21, 32 }
  0x1a   : > { %v191_v2 = vld [vmem:[%s190_s5] sm:$0xff]  ;;  %p499_p12 = scmp.ne.s32.totalorder %s677_s21, %s498_s29  ;;  %s502_s30 = sshll.u32 %s580_s15, 4  ;;  %s503_s30 = int_to_ptr.vmem [resolvable:$false] %s502_s30 }
  0x1b   : > { %193 = vxpose.xlu0.b32.start.end [1/1] (short) (narrow) %v191_v2, 8  ;;  %s504_s4 = scalar_lea.vmem %s503_s30, 64  ;;  %p505_p1 = scmp.lt.s32.totalorder %s677_s21, %s503_s30 }
  0x1c   : > { %p500_p13 = pnand %p499_p12, %p641_p4  ;;  %p506_p2 = scmp.lt.s32.totalorder %s504_s4, %s498_s29 }
  0x1e   : > { %p501_p0 = pneg %p500_p13  ;;  %p507_p3 = por %p506_p2, %p505_p1 }
  0x20   : > { %p508_p5 = pnand %p507_p3, %p501_p0 }
  0x9b   : > { %v209_v3 = vpop.trf.xlu0 }
  0x9c   : > { %439 = vmatmul.mubr.msk.f32.vlgmr.msra.gmra.mrb[0].mxu0 %vm225_vm1, %v209_v3 }
 0x16f   : > { %v295_v5 = vpop.f32.mrb[0].mxu0 }
 0x170   : > { %v305_v6 = vmul.f32 %v427_v4, %v295_v5  ;;  %v440_v7 = vpop.f32.mrb[1].mxu0 }
 0x172   : > { %v306_v8 = vfloor.f32 %v305_v6 }
 0x174   : > { %v307_v10 = vsub.f32 %v305_v6, %v306_v8 }
 0x176   : > { %v312_v11 = vadd.f32 %v428_v9, %v307_v10 }
 0x178   : > { %v313_v12 = vfloor.f32 %v312_v11 }
 0x17a   : > { %v314_v13 = vsub.f32 %v312_v11, %v313_v12 }
 0x17c   : > { %v429_v14 = vadd.f32 -0.5, %v314_v13 }
 0x17e   : > { %v316_v15 = vmul.f32 %v429_v14, %v429_v14 }
 0x180   : > { %v317_v16 = vmul.f32 0.7181223, %v316_v15 }
 0x182   : > { %v318_v17 = vadd.f32 -3.8199525, %v317_v16 }
 0x184   : > { %v319_v18 = vmul.f32 %v318_v17, %v316_v15 }
 0x186   : > { %v320_v19 = vadd.f32 15.094643, %v319_v18 }
 0x188   : > { %v321_v20 = vmul.f32 %v320_v19, %v316_v15 }
 0x18a   : > { %v322_v21 = vadd.f32 -42.058693, %v321_v20 }
 0x18c   : > { %v323_v22 = vmul.f32 %v322_v21, %v316_v15 }
 0x18e   : > { %v324_v23 = vadd.f32 76.70586, %v323_v22 }
 0x190   : > { %v325_v24 = vmul.f32 %v324_v23, %v316_v15 }
 0x192   : > { %v326_v25 = vadd.f32 -81.60525, %v325_v24 }
 0x194   : > { %v327_v26 = vmul.f32 %v326_v25, %v316_v15 }
 0x196   : > { %v328_v27 = vadd.f32 41.3417, %v327_v26 }
 0x198   : > { %v329_v28 = vmul.f32 %v328_v27, %v316_v15 }
 0x19a   : > { %v330_v29 = vadd.f32 -6.2831855, %v329_v28 }
 0x19c   : > { %v331_v30 = vmul.f32 %v429_v14, %v330_v29 }
 0x19e   : > { %332 = vst [vmem:[%s183_s19] sm:$0x3] %v331_v30 }
 0x19f   : > { %511 = shalt.err (!%p508_p5)
}
 0x1a0   : > { %s512_s5 = scalar_lea.hbm %s675_s27, 32  ;;  %s516_s8 = scalar_lea.hbm %s725_s3, 64 }
 0x1a1   : > { %p513_p6 = scmp.ne.s32.totalorder %s675_s27, %s512_s5  ;;  %p517_p10 = scmp.lt.u32.totalorder %s675_s27, %s725_s3 }
 0x1a2   : > { %p518_p11 = scmp.lt.u32.totalorder %s516_s8, %s512_s5  ;;  %p520_p13 = scmp.lt.u32.totalorder %s512_s5, %s675_s27 }
 0x1a3   : > { %p514_p7 = pnand %p513_p6, %p641_p4 }
 0x1a4   : > { %p519_p12 = por %p518_p11, %p517_p10 }
 0x1a5   : > { %p515_p9 = pneg %p514_p7 }
 0x1a6   : > { %p521_p0 = por %p520_p13, %p519_p12 }
 0x1a8   : > { %p522_p1 = pnand %p521_p0, %p515_p9 }
 0x1aa   : > { %525 = shalt.err (!%p522_p1)
}
 0x1ab   : > { %441 = dma.vmem_to_hbm [thread:$0]  (%p641_p4), %s677_s21, 32, %s675_s27, %s334_s28  }
 0x1ac PF: > { %p447_p2 = scmp.ge.s32.totalorder %s576_s17, 2  ;;  %s360_s11 = sand.u32 1, %s556_s12  }
 0x1ad   : > { %s361_s18 = scalar_lea.sflag [#allocation3], %s360_s11 }
 0x1ae   : > { %p444_p3 = pnand %p447_p2, %p648_p8 }
 0x1b0   : > { %551 = dma.done.wait (!%p444_p3), %s361_s18, 32  }
 0x1b1   : > { %553 = vsyncadd (!%p444_p3), %s361_s18, 4294967264  ;;  %s16_s17 = sadd.s32 1, %s576_s17   ;;  %s728_s12 = smov %s560_s13 }
 0x1b2   : > { %p13_p5 = scmp.ge.s32.totalorder %s16_s17, 4   ;;  %s729_s13 = smov %s564_s14 }
 0x1b3   : > { %s730_s14 = smov %s654_s25  ;;  %s731_s15 = smov %s572_s16 }
 0x1b4   : > { %s732_s16 = smov %s734_s20  ;;  %15 = sbr.rel (!%p13_p5) target bundleno = 4 (0x4), region = 67 }
 0x1bb   :  { %366 = vsyncpa [#allocation3], 1 }
 0x1bc   :  { %368 = vsyncpa [#allocation3 + $0x1], 1 }

</bundles_post_ra>
